<compile_context>
chip_gen: v5e
topology: v5e:2x2
jax: 0.10.0
libtpu: 0.0.40
codegen_flags: <defaults>
</compile_context>

<pallas_src>
import math

import jax
import jax.numpy as jnp
from jax.experimental import pallas as pl
from jax.experimental.pallas import tpu as pltpu


def _round_up(x, m):
    return -(-x // m) * m


def _make_kernel(state_size, fc1_units, fc2_units, action_size, matmul_dtype):
    S = state_size
    A = action_size
    half_log_2pi = 0.5 * math.log(2.0 * math.pi)

    def kernel(xin_ref, w1_ref, w2_ref, wh_ref, b_ref, out_ref):
        # Packed transposed input: rows [0,S) = x^T, rows [S,S+A) = noise^T.
        xT = xin_ref[0:S, :]
        noiseT = xin_ref[S:S + A, :]

        # Packed bias columns: col 0 -> b1, col 1 -> b2, col 2 -> [bm|bs|bc].
        b1 = b_ref[0:fc1_units, 0:1]
        b2 = b_ref[0:fc2_units, 1:2]
        bh = b_ref[0:2 * A + 1, 2:3]

        def mm(w, a):
            return jnp.dot(w.astype(matmul_dtype), a.astype(matmul_dtype),
                           preferred_element_type=jnp.float32)

        # fc1 + ReLU, fc2 + ReLU (feature-major: W^T @ x^T, batch lives on the lane axis)
        h1 = jnp.maximum(mm(w1_ref[...], xT) + b1, 0.0)
        h2 = jnp.maximum(mm(w2_ref[...], h1) + b2, 0.0)

        # Fused heads: one MXU pass producing rows [mean_pre | std_pre | v].
        heads = mm(wh_ref[...], h2) + bh

        mean = jnp.tanh(heads[0:A, :])
        std = jnp.logaddexp(heads[A:2 * A, :], 0.0)   # softplus, numerically stable
        v = heads[2 * A:2 * A + 1, :]
        log_std = jnp.log(std)

        # Normal(mean, std) sampled via reparameterization; direct sublane-slice writes.
        out_ref[0:A, :] = mean + std * noiseT                               # action
        out_ref[A:2 * A, :] = -0.5 * noiseT * noiseT - log_std - half_log_2pi  # log_prob
        out_ref[2 * A:3 * A, :] = 0.5 + half_log_2pi + log_std              # entropy
        out_ref[3 * A:3 * A + 1, :] = v                                     # critic value

    return kernel


def actor_critic_forward(x, noise, params, *, block_batch=4096,
                         matmul_dtype=jnp.float32):
    """x: [B, state_size] f32, noise: [B, action_size] f32 standard normal."""
    B, state_size = x.shape
    fc1_units = params["w1"].shape[1]
    fc2_units = params["w2"].shape[1]
    A = params["wm"].shape[1]
    S = state_size

    # --- weight prep (feature-major layout: W^T, [out, in]) -------------------------
    w1t = params["w1"].T                                             # [fc1, S]
    w2t = params["w2"].T                                             # [fc2, fc1]
    wht = jnp.concatenate([params["wm"], params["ws"], params["wc"]], axis=1).T
    # wht: [2A+1, fc2]  (mean | std | critic rows)
    if matmul_dtype != jnp.float32:
        w1t = w1t.astype(matmul_dtype)
        w2t = w2t.astype(matmul_dtype)
        wht = wht.astype(matmul_dtype)

    # Biases packed as columns of a single [max_feat, 3] array (broadcast over lanes).
    maxf = max(fc1_units, fc2_units, 2 * A + 1)

    def pad_col(b, n):
        return jnp.pad(b.reshape(-1, 1), ((0, maxf - n), (0, 0)))

    bh_row = jnp.concatenate([params["bm"], params["bs"], params["bc"]], axis=1)
    b_packed = jnp.concatenate(
        [pad_col(params["b1"], fc1_units),
         pad_col(params["b2"], fc2_units),
         pad_col(bh_row, 2 * A + 1)], axis=1)                        # [maxf, 3]

    # --- input prep: pack x|noise, transpose to batch-in-lanes ----------------------
    xin = jnp.concatenate([x, noise], axis=1).T                      # [S+A, B]

    # Batch tile: lanes carry batch, so tiles are multiples of 128 (or one full block).
    if B <= 256:
        TB = B                       # single full block: no padding, no extra passes
        pB = B
    else:
        TB = min(_round_up(block_batch, 128), _round_up(pl.cdiv(B, 2), 128))
        TB = max(TB, 128)
        pB = _round_up(B, TB)
        if pB != B:
            xin = jnp.pad(xin, ((0, 0), (0, pB - B)))

    out_rows = 3 * A + 1
    kernel = _make_kernel(S, fc1_units, fc2_units, A, matmul_dtype)

    def batched(rows):
        return pl.BlockSpec((rows, TB), lambda i: (0, i))

    def resident(shape):
        return pl.BlockSpec(shape, lambda i: (0,) * len(shape))

    # NOTE: resident specs could be single-buffered (pipeline_mode=pl.Buffered(1));
    # omitted here for maximal compatibility — the VMEM saving is tiny at these sizes.
    slab = pl.pallas_call(
        kernel,
        out_shape=jax.ShapeDtypeStruct((out_rows, pB), jnp.float32),
        grid=(pB // TB,),
        in_specs=[
            batched(S + A),                              # packed x|noise (transposed)
            resident((fc1_units, S)),                    # W1^T
            resident((fc2_units, fc1_units)),            # W2^T
            resident((2 * A + 1, fc2_units)),            # fused head weights^T
            resident((maxf, 3)),                         # packed bias columns
        ],
        out_specs=batched(out_rows),
        compiler_params=pltpu.CompilerParams(
            dimension_semantics=("parallel",)),          # megacore split on v7x
    )(xin, w1t, w2t, wht, b_packed)

    slab = slab[:, :B].T                                 # [B, 3A+1]
    action = slab[:, 0:A]
    log_prob = slab[:, A:2 * A]
    entropy = slab[:, 2 * A:3 * A]
    v = slab[:, 3 * A:3 * A + 1]
    return action, log_prob, entropy, v


def init_params(key, state_size, fc1_units, fc2_units, action_size):
    """Deterministic init mimicking nn.Linear's U(-1/sqrt(fan_in), 1/sqrt(fan_in))."""
    def linear(key, fan_in, fan_out):
        kw, kb = jax.random.split(key)
        bound = 1.0 / math.sqrt(fan_in)
        w = jax.random.uniform(kw, (fan_in, fan_out), jnp.float32, -bound, bound)
        b = jax.random.uniform(kb, (1, fan_out), jnp.float32, -bound, bound)
        return w, b

    k1, k2, k3, k4, k5 = jax.random.split(key, 5)
    w1, b1 = linear(k1, state_size, fc1_units)
    w2, b2 = linear(k2, fc1_units, fc2_units)
    wm, bm = linear(k3, fc2_units, action_size)
    ws, bs = linear(k4, fc2_units, action_size)
    wc, bc = linear(k5, fc2_units, 1)
    # TODO(synk): the module's self.std Parameter is unused in forward(), so it is omitted.
    return dict(w1=w1, b1=b1, w2=w2, b2=b2, wm=wm, bm=bm, ws=ws, bs=bs, wc=wc, bc=bc)


if __name__ == "__main__":
    state_size, action_size = 16, 8
    fc1_units, fc2_units = 32, 32
    batch = 8

    key = jax.random.PRNGKey(0)
    kx, knoise, kparams = jax.random.split(key, 3)

    x = jax.random.normal(kx, (batch, state_size), jnp.float32)
    noise = jax.random.normal(knoise, (batch, action_size), jnp.float32)
    params = init_params(kparams, state_size, fc1_units, fc2_units, action_size)

    action, log_prob, entropy, v = actor_critic_forward(x, noise, params)
    jax.block_until_ready((action, log_prob, entropy, v))

    # Pure-JAX reference check (torch-equivalent formulas, f32).
    h1 = jnp.maximum(x @ params["w1"] + params["b1"], 0.0)
    h2 = jnp.maximum(h1 @ params["w2"] + params["b2"], 0.0)
    mean = jnp.tanh(h2 @ params["wm"] + params["bm"])
    std = jax.nn.softplus(h2 @ params["ws"] + params["bs"])
    act_ref = mean + std * noise
    logp_ref = (-((act_ref - mean) ** 2) / (2 * std * std)
                - jnp.log(std) - 0.5 * math.log(2 * math.pi))
    ent_ref = 0.5 + 0.5 * math.log(2 * math.pi) + jnp.log(std)
    v_ref = h2 @ params["wc"] + params["bc"]

    assert jnp.allclose(action, act_ref, atol=1e-5)
    assert jnp.allclose(log_prob, logp_ref, atol=1e-5)
    assert jnp.allclose(entropy, ent_ref, atol=1e-5)
    assert jnp.allclose(v, v_ref, atol=1e-5)

    print("KERNEL_OK")
</pallas_src>

<mosaic_0001>
module attributes {stable_mosaic.version = 11 : i64} {
  func.func @kernel(%arg0: i32, %arg1: memref<24x8xf32, #tpu.memory_space<vmem>>, %arg2: memref<32x16xf32, #tpu.memory_space<vmem>>, %arg3: memref<32x32xf32, #tpu.memory_space<vmem>>, %arg4: memref<17x32xf32, #tpu.memory_space<vmem>>, %arg5: memref<32x3xf32, #tpu.memory_space<vmem>>, %arg6: memref<25x8xf32, #tpu.memory_space<vmem>>) attributes {dimension_semantics = [#tpu.dimension_semantics<parallel>], iteration_bounds = array<i64: 1>, scalar_prefetch = 0 : i64, scratch_operands = 0 : i64, tpu.core_type = #tpu.core_type<tc>, window_params = [{transform_indices = @transform_0, window_bounds = array<i64: 24, 8>}, {pipeline_mode = #tpu.pipeline_mode<synchronous>, transform_indices = @transform_1, window_bounds = array<i64: 32, 16>}, {pipeline_mode = #tpu.pipeline_mode<synchronous>, transform_indices = @transform_2, window_bounds = array<i64: 32, 32>}, {pipeline_mode = #tpu.pipeline_mode<synchronous>, transform_indices = @transform_3, window_bounds = array<i64: 17, 32>}, {pipeline_mode = #tpu.pipeline_mode<synchronous>, transform_indices = @transform_4, window_bounds = array<i64: 32, 3>}, {transform_indices = @transform_5, window_bounds = array<i64: 25, 8>}]} {
    %c0 = arith.constant 0 : index
    %c0_0 = arith.constant 0 : index
    %0 = vector.load %arg1[%c0, %c0_0] : memref<24x8xf32, #tpu.memory_space<vmem>>, vector<16x8xf32>
    %c16 = arith.constant 16 : index
    %c0_1 = arith.constant 0 : index
    %1 = vector.load %arg1[%c16, %c0_1] : memref<24x8xf32, #tpu.memory_space<vmem>>, vector<8x8xf32>
    %c0_2 = arith.constant 0 : index
    %c0_3 = arith.constant 0 : index
    %2 = vector.load %arg5[%c0_2, %c0_3] : memref<32x3xf32, #tpu.memory_space<vmem>>, vector<32x1xf32>
    %c0_4 = arith.constant 0 : index
    %c1 = arith.constant 1 : index
    %3 = vector.load %arg5[%c0_4, %c1] : memref<32x3xf32, #tpu.memory_space<vmem>>, vector<32x1xf32>
    %c0_5 = arith.constant 0 : index
    %c2 = arith.constant 2 : index
    %4 = vector.load %arg5[%c0_5, %c2] : memref<32x3xf32, #tpu.memory_space<vmem>>, vector<17x1xf32>
    %c0_6 = arith.constant 0 : index
    %c0_7 = arith.constant 0 : index
    %5 = vector.load %arg2[%c0_6, %c0_7] : memref<32x16xf32, #tpu.memory_space<vmem>>, vector<32x16xf32>
    %cst = arith.constant dense<0.000000e+00> : vector<32x8xf32>
    %6 = tpu.matmul %5, %0, %cst {dimension_numbers = #tpu.dot_dimension_numbers<[1], [0], [0], [1], [0, 0, 1, 1], [], []>} : vector<32x16xf32>, vector<16x8xf32>, vector<32x8xf32> -> vector<32x8xf32>
    %7 = vector.broadcast %2 : vector<32x1xf32> to vector<32x8xf32>
    %8 = arith.addf %6, %7 : vector<32x8xf32>
    %cst_8 = arith.constant 0.000000e+00 : f32
    %9 = vector.broadcast %cst_8 : f32 to vector<32x8xf32>
    %10 = arith.maximumf %8, %9 : vector<32x8xf32>
    %c0_9 = arith.constant 0 : index
    %c0_10 = arith.constant 0 : index
    %11 = vector.load %arg3[%c0_9, %c0_10] : memref<32x32xf32, #tpu.memory_space<vmem>>, vector<32x32xf32>
    %cst_11 = arith.constant dense<0.000000e+00> : vector<32x8xf32>
    %12 = tpu.matmul %11, %10, %cst_11 {dimension_numbers = #tpu.dot_dimension_numbers<[1], [0], [0], [1], [0, 0, 1, 1], [], []>} : vector<32x32xf32>, vector<32x8xf32>, vector<32x8xf32> -> vector<32x8xf32>
    %13 = vector.broadcast %3 : vector<32x1xf32> to vector<32x8xf32>
    %14 = arith.addf %12, %13 : vector<32x8xf32>
    %cst_12 = arith.constant 0.000000e+00 : f32
    %15 = vector.broadcast %cst_12 : f32 to vector<32x8xf32>
    %16 = arith.maximumf %14, %15 : vector<32x8xf32>
    %c0_13 = arith.constant 0 : index
    %c0_14 = arith.constant 0 : index
    %17 = vector.load %arg4[%c0_13, %c0_14] : memref<17x32xf32, #tpu.memory_space<vmem>>, vector<17x32xf32>
    %cst_15 = arith.constant dense<0.000000e+00> : vector<17x8xf32>
    %18 = tpu.matmul %17, %16, %cst_15 {dimension_numbers = #tpu.dot_dimension_numbers<[1], [0], [0], [1], [0, 0, 1, 1], [], []>} : vector<17x32xf32>, vector<32x8xf32>, vector<17x8xf32> -> vector<17x8xf32>
    %19 = vector.broadcast %4 : vector<17x1xf32> to vector<17x8xf32>
    %20 = arith.addf %18, %19 : vector<17x8xf32>
    %21 = vector.extract_strided_slice %20 {offsets = [0, 0], sizes = [8, 8], strides = [1, 1]} : vector<17x8xf32> to vector<8x8xf32>
    %22 = math.tanh %21 : vector<8x8xf32>
    %23 = vector.extract_strided_slice %20 {offsets = [8, 0], sizes = [8, 8], strides = [1, 1]} : vector<17x8xf32> to vector<8x8xf32>
    %cst_16 = arith.constant 0.000000e+00 : f32
    %24 = vector.broadcast %cst_16 : f32 to vector<8x8xf32>
    %25 = arith.maximumf %23, %24 : vector<8x8xf32>
    %26 = vector.broadcast %cst_16 : f32 to vector<8x8xf32>
    %27 = arith.subf %23, %26 : vector<8x8xf32>
    %28 = arith.cmpf one, %27, %27 : vector<8x8xf32>
    %29 = vector.broadcast %cst_16 : f32 to vector<8x8xf32>
    %30 = arith.addf %23, %29 : vector<8x8xf32>
    %31 = math.absf %27 : vector<8x8xf32>
    %cst_17 = arith.constant 0.000000e+00 : f32
    %32 = vector.broadcast %cst_17 : f32 to vector<8x8xf32>
    %33 = arith.subf %32, %31 : vector<8x8xf32>
    %34 = math.exp %33 : vector<8x8xf32>
    %35 = math.log1p %34 : vector<8x8xf32>
    %36 = arith.addf %25, %35 : vector<8x8xf32>
    %37 = arith.select %28, %30, %36 : vector<8x8xi1>, vector<8x8xf32>
    %38 = vector.extract_strided_slice %20 {offsets = [16, 0], sizes = [1, 8], strides = [1, 1]} : vector<17x8xf32> to vector<1x8xf32>
    %39 = math.log %37 : vector<8x8xf32>
    %40 = arith.mulf %37, %1 : vector<8x8xf32>
    %41 = arith.addf %22, %40 : vector<8x8xf32>
    %c0_18 = arith.constant 0 : index
    %c0_19 = arith.constant 0 : index
    %42 = vector.load %arg6[%c0_18, %c0_19] : memref<25x8xf32, #tpu.memory_space<vmem>>, vector<8x8xf32>
    tpu.vector_store %arg6[%c0_18, %c0_19], %41 {strides = array<i32>} : memref<25x8xf32, #tpu.memory_space<vmem>>, vector<8x8xf32>,
    %cst_20 = arith.constant -5.000000e-01 : f32
    %43 = vector.broadcast %cst_20 : f32 to vector<8x8xf32>
    %44 = arith.mulf %43, %1 : vector<8x8xf32>
    %45 = arith.mulf %44, %1 : vector<8x8xf32>
    %46 = arith.subf %45, %39 : vector<8x8xf32>
    %cst_21 = arith.constant 0.918938517 : f32
    %47 = vector.broadcast %cst_21 : f32 to vector<8x8xf32>
    %48 = arith.subf %46, %47 : vector<8x8xf32>
    %c8 = arith.constant 8 : index
    %c0_22 = arith.constant 0 : index
    %49 = vector.load %arg6[%c8, %c0_22] : memref<25x8xf32, #tpu.memory_space<vmem>>, vector<8x8xf32>
    tpu.vector_store %arg6[%c8, %c0_22], %48 {strides = array<i32>} : memref<25x8xf32, #tpu.memory_space<vmem>>, vector<8x8xf32>,
    %cst_23 = arith.constant 1.41893852 : f32
    %50 = vector.broadcast %cst_23 : f32 to vector<8x8xf32>
    %51 = arith.addf %50, %39 : vector<8x8xf32>
    %c16_24 = arith.constant 16 : index
    %c0_25 = arith.constant 0 : index
    %52 = vector.load %arg6[%c16_24, %c0_25] : memref<25x8xf32, #tpu.memory_space<vmem>>, vector<8x8xf32>
    tpu.vector_store %arg6[%c16_24, %c0_25], %51 {strides = array<i32>} : memref<25x8xf32, #tpu.memory_space<vmem>>, vector<8x8xf32>,
    %c24 = arith.constant 24 : index
    %c0_26 = arith.constant 0 : index
    %53 = vector.load %arg6[%c24, %c0_26] : memref<25x8xf32, #tpu.memory_space<vmem>>, vector<1x8xf32>
    tpu.vector_store %arg6[%c24, %c0_26], %38 {strides = array<i32>} : memref<25x8xf32, #tpu.memory_space<vmem>>, vector<1x8xf32>,
    return
  }
  func.func @transform_0(%arg0: i32) -> (i32, i32) {
    %c0_i32 = arith.constant 0 : i32
    %c0_i32_0 = arith.constant 0 : i32
    return %c0_i32, %arg0 : i32, i32
  }
  func.func @transform_1(%arg0: i32) -> (i32, i32) {
    %c0_i32 = arith.constant 0 : i32
    %c0_i32_0 = arith.constant 0 : i32
    %c0_i32_1 = arith.constant 0 : i32
    return %c0_i32, %c0_i32_0 : i32, i32
  }
  func.func @transform_2(%arg0: i32) -> (i32, i32) {
    %c0_i32 = arith.constant 0 : i32
    %c0_i32_0 = arith.constant 0 : i32
    %c0_i32_1 = arith.constant 0 : i32
    return %c0_i32, %c0_i32_0 : i32, i32
  }
  func.func @transform_3(%arg0: i32) -> (i32, i32) {
    %c0_i32 = arith.constant 0 : i32
    %c0_i32_0 = arith.constant 0 : i32
    %c0_i32_1 = arith.constant 0 : i32
    return %c0_i32, %c0_i32_0 : i32, i32
  }
  func.func @transform_4(%arg0: i32) -> (i32, i32) {
    %c0_i32 = arith.constant 0 : i32
    %c0_i32_0 = arith.constant 0 : i32
    %c0_i32_1 = arith.constant 0 : i32
    return %c0_i32, %c0_i32_0 : i32, i32
  }
  func.func @transform_5(%arg0: i32) -> (i32, i32) {
    %c0_i32 = arith.constant 0 : i32
    %c0_i32_0 = arith.constant 0 : i32
    return %c0_i32, %arg0 : i32, i32
  }
}

</mosaic_0001>

<bundles_post_ra>
// kernel: tpu_custom_call.1
= control target key start
LH: loop header
LB: loop body
LE: loop exit
PB: predicated region body
PF: predicated region fallthrough
CT: control target
= control target key end

     0   :  { %v290_v2 = vmov 0   ;;  %vm52_vm0 = vcmask 130048   ;;  %v291_v16 = vmov 1   ;;  %vm118_vm1 = vcmask 261120   ;;  %s408_s0 = inlined_call_operand.vmem [shape: f32[24,8], index: 0, kind: input, shape index: {}]   ;;  %s409_s1 = inlined_call_operand.vmem [shape: f32[32,16], index: 1, kind: input, shape index: {}]   ;;  %s410_s4 = inlined_call_operand.vmem [shape: f32[32,3], index: 4, kind: input, shape index: {}]   ;;  %s411_s2 = inlined_call_operand.vmem [shape: f32[32,32], index: 2, kind: input, shape index: {}]   ;;  %s412_s3 = inlined_call_operand.vmem [shape: f32[17,32], index: 3, kind: input, shape index: {}]   ;;  %s413_s5 = inlined_call_operand.vmem [shape: f32[25,8], index: 5, kind: output, shape index: {}]  }
   0x1   :  { %v21_v0 = vld [vmem:[%s408_s0 + $0x8] sm:$0xff]  ;;  %v20_v1 = vld [vmem:[%s408_s0] sm:$0xff]  ;;  %275 = vset.pattern.permute.xlu1 %v290_v2  ;;  %274 = vset.pattern.permute.xlu0 %v290_v2  ;;  %v31_v5 = vld [vmem:[%s409_s1 + $0x18] sm:$0xff]  ;;  %v292_v34 = vmov 2   ;;  %vm247_vm2 = vcmask 57344   ;;  %vm238_vm5 = vcmask 64512  }
   0x2   :  { %79 = vmatpush.msra.mxu0 %v21_v0  ;;  %v28_v3 = vld [vmem:[%s409_s1] sm:$0xff]  ;;  %v335_v4 = vld [vmem:[%s410_s4 + $0x8] sm:$0xff]  ;;  %265 = vmatpush.msra.mxu1 %v21_v0  ;;  %v26_v6 = vld [vmem:[%s410_s4 + $0x18] sm:$0xff] }
   0x3   :  { %39 = vperm.xlu1 %275, %v335_v4   ;;  %49 = vperm.xlu0 %274, %v26_v6   ;;  %v23_v7 = vld [vmem:[%s410_s4] sm:$0xff]  ;;  %v29_v8 = vld [vmem:[%s409_s1 + $0x8] sm:$0xff]  ;;  %v25_v9 = vld [vmem:[%s410_s4 + $0x10] sm:$0xff] }
   0x4   :  { %80 = vmatpush.msra.mxu0 %v20_v1  ;;  %266 = vmatpush.msra.mxu1 %v20_v1  ;;  %v30_v10 = vld [vmem:[%s409_s1 + $0x10] sm:$0xff]  ;;  %v99_v28 = vld [vmem:[%s411_s2 + $0x8] sm:$0xff]  ;;  %v98_v29 = vld [vmem:[%s411_s2] sm:$0xff] }
   0x5   :  { %253 = vmatmul.msk.f32.vlgmr.msra.gmra.mxu0 %vm52_vm0, %v28_v3  ;;  %256 = vmatmul.msk.f32.vlgmr.msra.gmra.mxu1 %vm52_vm0, %v31_v5  ;;  %v100_v30 = vld [vmem:[%s411_s2 + $0x10] sm:$0xff]  ;;  %v101_v31 = vld [vmem:[%s411_s2 + $0x18] sm:$0xff]  ;;  %v164_v50 = vld [vmem:[%s412_s3] sm:$0xff] }
   0x6   :  { %276 = vset.pattern.permute.xlu2 %v291_v16  ;;  %v27_v36 = vld [vmem:[%s410_s4 + $0x10] sm:$0x1]  ;;  %v165_v51 = vld [vmem:[%s412_s3 + $0x8] sm:$0xff] }
   0x7   :  { %115 = vperm.xlu2 %276, %v26_v6   ;;  %v166_v52 = vld [vmem:[%s412_s3 + $0x10] sm:$0x1] }
   0xb   :  { %34 = vperm.xlu1 %275, %v23_v7   ;;  %44 = vperm.xlu0 %274, %v25_v9  }
   0xd   :  { %254 = vmatmul.msk.f32.gmra.mxu0 %vm52_vm0, %v29_v8 }
   0xf   :  { %111 = vperm.xlu2 %276, %v25_v9  }
  0x13   :  { %277 = vset.pattern.permute.xlu0 %v291_v16  ;;  %278 = vset.pattern.permute.xlu1 %v291_v16 }
  0x14   :  { %107 = vperm.xlu0 %277, %v335_v4   ;;  %103 = vperm.xlu1 %278, %v23_v7  }
  0x15   :  { %255 = vmatmul.msk.f32.gmra.mxu0 %vm52_vm0, %v30_v10 }
  0x17   :  { %279 = vset.pattern.permute.xlu2 %v292_v34 }
  0x18   :  { %172 = vperm.xlu2 %279, %v335_v4  }
  0x1c   :  { %280 = vset.pattern.permute.xlu1 %v292_v34  ;;  %281 = vset.pattern.permute.xlu0 %v292_v34 }
  0x1d   :  { %168 = vperm.xlu1 %280, %v23_v7  }
  0x20   :  { %177 = vperm.xlu2 %279, %v27_v36  }
  0x61   :  { %v116_v33 = vpop.permute.xlu2 %115 }
  0x69   :  { %v112_v37 = vpop.permute.xlu2 %111 }
  0x72   :  { %v173_v54 = vpop.permute.xlu2 %172 }
  0x75   :  { %v50_v11 = vpop.permute.xlu0 %49  ;;  %v40_v17 = vpop.permute.xlu1 %39 }
  0x7a   :  { %v178_v60 = vpop.permute.xlu2 %177 }
  0x7d   :  { %v35_v19 = vpop.permute.xlu1 %34  ;;  %v45_v20 = vpop.permute.xlu0 %44 }
  0x82   :  { %v82_v12 = vpop.f32.mrf.mxu0  ;;  %v91_v13 = vpop.f32.mrf.mxu1 }
  0x83   :  { %v92_v14 = vadd.f32 %v91_v13, %v50_v11  ;;  %v83_v24 = vadd.f32 %v82_v12, %v35_v19  ;;  %v22_v11 = vld [vmem:[%s408_s0 + $0x10] sm:$0xff] }
  0x84   :  { %v240_v16 = vmul.f32 -0.5, %v22_v11 }
  0x85   :  { %v97_v15 = vmax.f32 %v92_v14, 0.0  ;;  %v94_v27 = vmax.f32 %v83_v24, 0.0 }
  0x86   :  { %v108_v38 = vpop.permute.xlu0 %107  ;;  %v104_v39 = vpop.permute.xlu1 %103 }
  0x87   :  { %143 = vmatpush.msrb.mxu1 %v97_v15  ;;  %267 = vmatpush.msra.mxu3 %v97_v15 }
  0x8a   :  { %v85_v18 = vpop.f32.mrf.mxu0 }
  0x8b   :  { %v86_v22 = vadd.f32 %v85_v18, %v40_v17  ;;  %v241_v18 = vmul.f32 %v240_v16, %v22_v11 }
  0x8d   :  { %v95_v26 = vmax.f32 %v86_v22, 0.0 }
  0x8f   :  { %v169_v2 = vpop.permute.xlu1 %168 }
  0x92   :  { %v88_v21 = vpop.f32.mrf.mxu0 }
  0x93   :  { %v89_v23 = vadd.f32 %v88_v21, %v45_v20 }
  0x95   :  { %v96_v25 = vmax.f32 %v89_v23, 0.0 }
  0x97   :  { %144 = vmatpush.msrb.mxu1 %v96_v25  ;;  %268 = vmatpush.msra.mxu3 %v96_v25 }
  0x99   :  { %145 = vmatpush.msrb.mxu1 %v95_v26  ;;  %269 = vmatpush.msra.mxu3 %v95_v26 }
  0x9b   :  { %146 = vmatpush.msrb.mxu1 %v94_v27  ;;  %270 = vmatpush.msra.mxu3 %v94_v27 }
  0x9c   :  { %258 = vmatmul.msk.f32.vlgmr.msra.gmra.mxu3 %vm118_vm1, %v99_v28  ;;  %257 = vmatmul.msk.f32.vlgmr.msrb.gmra.mxu1 %vm118_vm1, %v98_v29 }
  0xa4   :  { %259 = vmatmul.msk.f32.gmra.mxu3 %vm118_vm1, %v100_v30 }
  0xac   :  { %260 = vmatmul.msk.f32.gmra.mxu3 %vm118_vm1, %v101_v31 }
 0x119   :  { %v148_v41 = vpop.f32.mrf.mxu1 }
 0x11a   :  { %v149_v46 = vadd.f32 %v148_v41, %v104_v39 }
 0x11c   :  { %v160_v49 = vmax.f32 %v149_v46, 0.0 }
 0x11f   :  { %v151_v32 = vpop.f32.mrf.mxu3 }
 0x120   :  { %v152_v44 = vadd.f32 %v151_v32, %v108_v38 }
 0x122   :  { %v161_v48 = vmax.f32 %v152_v44, 0.0 }
 0x127   :  { %v154_v35 = vpop.f32.mrf.mxu3 }
 0x128   :  { %v155_v42 = vadd.f32 %v154_v35, %v112_v37 }
 0x12a   :  { %v162_v47 = vmax.f32 %v155_v42, 0.0 }
 0x12f   :  { %v157_v40 = vpop.f32.mrf.mxu3 }
 0x130   :  { %v158_v43 = vadd.f32 %v157_v40, %v116_v33 }
 0x132   :  { %v163_v45 = vmax.f32 %v158_v43, 0.0 }
 0x134   :  { %201 = vmatpush.msra.mxu2 %v163_v45 }
 0x136   :  { %202 = vmatpush.msra.mxu2 %v162_v47 }
 0x138   :  { %203 = vmatpush.msra.mxu2 %v161_v48 }
 0x13a   :  { %204 = vmatpush.msra.mxu2 %v160_v49 }
 0x13b   :  { %261 = vmatmul.msk.f32.vlgmr.msra.gmra.mxu2 %vm118_vm1, %v164_v50 }
 0x143   :  { %262 = vmatmul.msk.f32.gmra.mxu2 %vm118_vm1, %v165_v51 }
 0x14b   :  { %263 = vmatmul.msk.f32.gmra.mxu2 %vm118_vm1, %v166_v52 }
 0x1be   :  { %v206_v53 = vpop.f32.mrf.mxu2 }
 0x1bf   :  { %v207_v4 = vadd.f32 %v206_v53, %v169_v2 }
 0x1c6   :  { %v209_v55 = vpop.f32.mrf.mxu2 }
 0x1c7   :  { %v210_v56 = vadd.f32 %v209_v55, %v173_v54 }
 0x1c9   :  { %v219_v57 = vand.u32 2147483647, %v210_v56  ;;  %v216_v9 = vmax.f32 %v210_v56, 0.0  ;;  %vm217_vm4 = vcmp.ne.f32.partialorder %v210_v56, %v210_v56 }
 0x1cb   :  { %v220_v58 = vsub.f32 0.0, %v219_v57 }
 0x1cd   :  { %v221_v59 = vmul.f32 1.442695, %v220_v58 }
 0x1ce   :  { %v212_v61 = vpop.f32.mrf.mxu2 }
 0x1cf   :  { %282 = vpow2.f32 %v221_v59  ;;  %v213_v62 = vadd.f32 %v212_v61, %v178_v60 }
 0x1d1   :  { %248 = vst.msk [vmem:[%s413_s5 + $0x18] sm:$0x1] %vm247_vm2, %v213_v62 }
 0x1d5   :  { %v283_v63 = vpop.eup %282 }
 0x1d6   :  { %v223_v0 = vadd.f32 1.0, %v283_v63  ;;  %v226_v1 = vmul.f32 -0.5, %v283_v63  ;;  %v229_v5 = vand.u32 2147483647, %v283_v63 }
 0x1d8   :  { %284 = vlog2.f32 %v223_v0  ;;  %v227_v3 = vadd.f32 1.0, %v226_v1  ;;  %vm230_vm3 = vcmp.lt.f32.partialorder %v229_v5, 0.0004427343 }
 0x1d9   :  { %286 = vtanh.f32 %v207_v4 }
 0x1da   :  { %v228_v8 = vmul.f32 %v283_v63, %v227_v3 }
 0x1de   :  { %v285_v6 = vpop.eup %284 }
 0x1df   :  { %v225_v7 = vmul.f32 0.6931472, %v285_v6  ;;  %v287_v15 = vpop.eup %286 }
 0x1e1   :  { %v231_v10 = vsel %vm230_vm3, %v228_v8, %v225_v7 }
 0x1e2   :  { %v232_v12 = vadd.f32 %v231_v10, %v216_v9 }
 0x1e4   :  { %v233_v13 = vsel %vm217_vm4, %v210_v56, %v232_v12 }
 0x1e5   :  { %288 = vlog2.f32 %v233_v13  ;;  %v236_v14 = vmul.f32 %v233_v13, %v22_v11 }
 0x1e7   :  { %v237_v17 = vadd.f32 %v287_v15, %v236_v14 }
 0x1e9   :  { %239 = vst.msk [vmem:[%s413_s5] sm:$0xff] %vm238_vm5, %v237_v17 }
 0x1eb   :  { %v289_v19 = vpop.eup %288 }
 0x1ec   :  { %v235_v20 = vmul.f32 0.6931472, %v289_v19 }
 0x1ee   :  { %v242_v21 = vsub.f32 %v241_v18, %v235_v20  ;;  %v245_v22 = vadd.f32 1.4189385, %v235_v20 }
 0x1f0   :  { %v264_v23 = vadd.f32 -0.9189385, %v242_v21  ;;  %246 = vst.msk [vmem:[%s413_s5 + $0x10] sm:$0xff] %vm238_vm5, %v245_v22 }
 0x1f2   :  { %244 = vst.msk [vmem:[%s413_s5 + $0x8] sm:$0xff] %vm238_vm5, %v264_v23 }

</bundles_post_ra>
